<compile_context>
chip_gen: v7x
topology: tpu7x:2x2x1
jax: 0.10.0
libtpu: 0.0.40
codegen_flags: <defaults>
</compile_context>

<pallas_src>
import functools

import jax
import jax.numpy as jnp
from jax.experimental import pallas as pl
from jax.experimental.pallas import tpu as pltpu

LN_EPS = 1e-5


def _je_child_kernel(x_ref, w_ref, b_ref, o_ref, *, matmul_dtype):
    # x_ref: (tb, D)  -- one batch tile, features on lanes
    # w_ref: (N, D)   -- full weight, native PyTorch layout, resident across the grid
    # b_ref: (1, N)   -- bias as a row, broadcast along sublanes
    # o_ref: (tb, N)  -- output tile written directly in [B, N] orientation
    if matmul_dtype is None:
        cd = jnp.promote_types(x_ref.dtype, w_ref.dtype)
    else:
        cd = matmul_dtype
    x = x_ref[...].astype(cd)
    w = w_ref[...].astype(cd)

    # y = x @ W^T + b  -> (tb, N).  Contraction over D; MXU accumulates in f32.
    y = jax.lax.dot_general(
        x, w,
        dimension_numbers=(((1,), (1,)), ((), ())),
        preferred_element_type=jnp.float32,
    ) + b_ref[...]

    # LayerNorm over the feature axis: biased variance, eps=1e-5, no affine
    # (F.layer_norm default).  All statistics in f32.
    mean = jnp.mean(y, axis=-1, keepdims=True)
    centered = y - mean
    var = jnp.mean(centered * centered, axis=-1, keepdims=True)
    o_ref[...] = (centered * jax.lax.rsqrt(var + LN_EPS)).astype(o_ref.dtype)


def je_child_classifier(x, weight, bias, *, block_b=2048, matmul_dtype=None,
                        core_parallel=False):
    """Fused Linear + LayerNorm.

    x: [B, D] (f32 or bf16), weight: [N, D] f32 (PyTorch nn.Linear layout), bias: [N] f32.
    Returns [B, N] f32.  Set core_parallel=True on v7x (2 TensorCores per chip).
    """
    B, D = x.shape
    N = weight.shape[0]

    # Batch tile: lane-aligned multiple of 128, at least 128, no bigger than the
    # (padded) batch.  Batch is padded wrapper-side to a whole number of tiles so the
    # grid stays pipelined with bounded per-step VMEM; padding rows are sliced off below.
    b128 = ((B + 127) // 128) * 128
    tb = max(128, (min(block_b, b128) // 128) * 128)
    Bp = pl.cdiv(B, tb) * tb
    if Bp > B:
        x = jnp.pad(x, ((0, Bp - B), (0, 0)))
    grid = (Bp // tb,)

    bias_row = bias.reshape(1, N)  # free metadata reshape

    kernel = functools.partial(_je_child_kernel, matmul_dtype=matmul_dtype)

    # On v7x, CORE_PARALLEL actually shards grid iterations across the 2 TensorCores
    # (plain "parallel" measurably changes nothing on single-TC v5e/v6e).
    dim_sem = (pltpu.CORE_PARALLEL,) if core_parallel else ("parallel",)

    cost = pl.CostEstimate(
        flops=2 * Bp * N * D + 6 * Bp * N,
        transcendentals=Bp,  # one rsqrt per row
        bytes_accessed=(Bp * D * x.dtype.itemsize
                        + N * D * weight.dtype.itemsize
                        + N * bias.dtype.itemsize
                        + Bp * N * 4),
    )

    out = pl.pallas_call(
        kernel,
        out_shape=jax.ShapeDtypeStruct((Bp, N), jnp.float32),
        grid=grid,
        in_specs=[
            pl.BlockSpec((tb, D), lambda i: (i, 0)),  # x: one batch tile per step
            pl.BlockSpec((N, D), lambda i: (0, 0)),   # W: stays resident in VMEM
            pl.BlockSpec((1, N), lambda i: (0, 0)),   # b: stays resident in VMEM
        ],
        out_specs=pl.BlockSpec((tb, N), lambda i: (i, 0)),  # direct [B, N] store
        compiler_params=pltpu.CompilerParams(dimension_semantics=dim_sem),
        cost_estimate=cost,
    )(x, weight, bias_row)

    return out[:B] if Bp > B else out


def _trunc_normal(key, shape, std):
    # Matches timm trunc_normal_ closely enough for test inputs.
    return std * jax.random.truncated_normal(key, -2.0, 2.0, shape, jnp.float32)


def reference(x, weight, bias):
    y = jnp.dot(x, weight.T, precision=jax.lax.Precision.HIGHEST) + bias
    mean = jnp.mean(y, axis=-1, keepdims=True)
    var = jnp.mean((y - mean) ** 2, axis=-1, keepdims=True)
    return (y - mean) / jnp.sqrt(var + LN_EPS)


if __name__ == "__main__":
    input_dim = 32
    num_children = 16

    key = jax.random.PRNGKey(0)
    k_x1, k_x2, k_w1, k_w2, k_b2 = jax.random.split(key, 5)

    # --- Test 1: module-style init (trunc_normal std=2e-5 weight, zero bias),
    # multi-step pipelined grid (block_b=128 -> grid=(2,)). ---
    B1 = 256
    x1 = jax.random.normal(k_x1, (B1, input_dim), jnp.float32)
    w1 = _trunc_normal(k_w1, (num_children, input_dim), std=2e-5)
    b1 = jnp.zeros((num_children,), jnp.float32)

    out1 = jax.block_until_ready(je_child_classifier(x1, w1, b1, block_b=128))
    ref1 = reference(x1, w1, b1)
    assert out1.shape == (B1, num_children)
    # Tolerance absorbs default MXU precision vs. the HIGHEST-precision reference.
    assert jnp.allclose(out1, ref1, atol=1e-3, rtol=1e-3), "mismatch (init-scale test)"

    # --- Test 2: O(1)-scale params so the LayerNorm is actually exercised, plus a
    # small odd batch (B=8) to hit the wrapper-side pad-to-128 + slice path. ---
    B2 = 8
    x2 = jax.random.normal(k_x2, (B2, input_dim), jnp.float32)
    w2 = 0.1 * jax.random.normal(k_w2, (num_children, input_dim), jnp.float32)
    b2 = 0.1 * jax.random.normal(k_b2, (num_children,), jnp.float32)

    out2 = jax.block_until_ready(je_child_classifier(x2, w2, b2))
    ref2 = reference(x2, w2, b2)
    assert out2.shape == (B2, num_children)
    assert jnp.allclose(out2, ref2, atol=2e-2, rtol=2e-2), "mismatch (O(1)-scale test)"

    # --- Test 3: bf16 x handed in at the call boundary (halves the dominant HBM
    # read); f32 MXU accumulation + f32 LayerNorm inside the kernel. ---
    x3 = x1.astype(jnp.bfloat16)
    out3 = jax.block_until_ready(
        je_child_classifier(x3, w2, b2, matmul_dtype=jnp.bfloat16))
    ref3 = reference(x3.astype(jnp.float32), w2, b2)
    assert out3.shape == (B1, num_children)
    assert jnp.allclose(out3, ref3, atol=5e-2, rtol=5e-2), "mismatch (bf16-x test)"

    print("KERNEL_OK")
</pallas_src>

<mosaic_0001>
module attributes {stable_mosaic.version = 11 : i64} {
  func.func @_je_child_kernel(%arg0: i32, %arg1: memref<128x32xf32, #tpu.memory_space<vmem>>, %arg2: memref<16x32xf32, #tpu.memory_space<vmem>>, %arg3: memref<1x16xf32, #tpu.memory_space<vmem>>, %arg4: memref<128x16xf32, #tpu.memory_space<vmem>>) attributes {dimension_semantics = [#tpu.dimension_semantics<parallel>], iteration_bounds = array<i64: 2>, scalar_prefetch = 0 : i64, scratch_operands = 0 : i64, tpu.core_type = #tpu.core_type<tc>, window_params = [{transform_indices = @transform_0, window_bounds = array<i64: 128, 32>}, {pipeline_mode = #tpu.pipeline_mode<synchronous>, transform_indices = @transform_1, window_bounds = array<i64: 16, 32>}, {pipeline_mode = #tpu.pipeline_mode<synchronous>, transform_indices = @transform_2, window_bounds = array<i64: 1, 16>}, {transform_indices = @transform_3, window_bounds = array<i64: 128, 16>}]} {
    %c0 = arith.constant 0 : index
    %c0_0 = arith.constant 0 : index
    %0 = vector.load %arg1[%c0, %c0_0] : memref<128x32xf32, #tpu.memory_space<vmem>>, vector<128x32xf32>
    %c0_1 = arith.constant 0 : index
    %c0_2 = arith.constant 0 : index
    %1 = vector.load %arg2[%c0_1, %c0_2] : memref<16x32xf32, #tpu.memory_space<vmem>>, vector<16x32xf32>
    %cst = arith.constant dense<0.000000e+00> : vector<128x16xf32>
    %2 = tpu.matmul %0, %1, %cst {dimension_numbers = #tpu.dot_dimension_numbers<[1], [1], [0], [0], [0, 0, 1, 0], [], []>} : vector<128x32xf32>, vector<16x32xf32>, vector<128x16xf32> -> vector<128x16xf32>
    %c0_3 = arith.constant 0 : index
    %c0_4 = arith.constant 0 : index
    %3 = vector.load %arg3[%c0_3, %c0_4] : memref<1x16xf32, #tpu.memory_space<vmem>>, vector<1x16xf32>
    %4 = vector.broadcast %3 : vector<1x16xf32> to vector<128x16xf32>
    %5 = arith.addf %2, %4 : vector<128x16xf32>
    %cst_5 = arith.constant dense<0.000000e+00> : vector<128xf32>
    %6 = vector.multi_reduction <add>, %5, %cst_5 [1] : vector<128x16xf32> to vector<128xf32>
    %7 = vector.shape_cast %6 : vector<128xf32> to vector<128x1xf32>
    %cst_6 = arith.constant 1.600000e+01 : f32
    %8 = vector.broadcast %cst_6 : f32 to vector<128x1xf32>
    %9 = arith.divf %7, %8 : vector<128x1xf32>
    %10 = vector.broadcast %9 : vector<128x1xf32> to vector<128x16xf32>
    %11 = arith.subf %5, %10 : vector<128x16xf32>
    %12 = arith.mulf %11, %11 : vector<128x16xf32>
    %cst_7 = arith.constant dense<0.000000e+00> : vector<128xf32>
    %13 = vector.multi_reduction <add>, %12, %cst_7 [1] : vector<128x16xf32> to vector<128xf32>
    %14 = vector.shape_cast %13 : vector<128xf32> to vector<128x1xf32>
    %cst_8 = arith.constant 1.600000e+01 : f32
    %15 = vector.broadcast %cst_8 : f32 to vector<128x1xf32>
    %16 = arith.divf %14, %15 : vector<128x1xf32>
    %cst_9 = arith.constant 9.99999974E-6 : f32
    %17 = vector.broadcast %cst_9 : f32 to vector<128x1xf32>
    %18 = arith.addf %16, %17 : vector<128x1xf32>
    %19 = math.rsqrt %18 : vector<128x1xf32>
    %20 = vector.broadcast %19 : vector<128x1xf32> to vector<128x16xf32>
    %21 = arith.mulf %11, %20 : vector<128x16xf32>
    %c0_10 = arith.constant 0 : index
    %c0_11 = arith.constant 0 : index
    %22 = vector.load %arg4[%c0_10, %c0_11] : memref<128x16xf32, #tpu.memory_space<vmem>>, vector<128x16xf32>
    tpu.vector_store %arg4[%c0_10, %c0_11], %21 {strides = array<i32>} : memref<128x16xf32, #tpu.memory_space<vmem>>, vector<128x16xf32>,
    return
  }
  func.func @transform_0(%arg0: i32) -> (i32, i32) {
    %c0_i32 = arith.constant 0 : i32
    %c0_i32_0 = arith.constant 0 : i32
    return %arg0, %c0_i32 : i32, i32
  }
  func.func @transform_1(%arg0: i32) -> (i32, i32) {
    %c0_i32 = arith.constant 0 : i32
    %c0_i32_0 = arith.constant 0 : i32
    %c0_i32_1 = arith.constant 0 : i32
    return %c0_i32, %c0_i32_0 : i32, i32
  }
  func.func @transform_2(%arg0: i32) -> (i32, i32) {
    %c0_i32 = arith.constant 0 : i32
    %c0_i32_0 = arith.constant 0 : i32
    %c0_i32_1 = arith.constant 0 : i32
    return %c0_i32, %c0_i32_0 : i32, i32
  }
  func.func @transform_3(%arg0: i32) -> (i32, i32) {
    %c0_i32 = arith.constant 0 : i32
    %c0_i32_0 = arith.constant 0 : i32
    return %arg0, %c0_i32 : i32, i32
  }
}

</mosaic_0001>

<bundles_post_ra>
// kernel: tpu_custom_call.1
= control target key start
LH: loop header
LB: loop body
LE: loop exit
PB: predicated region body
PF: predicated region fallthrough
CT: control target
= control target key end

     0   :  { %s833_s12 = smov 0   ;;  %s1090_s0 = inlined_call_operand.vmem [shape: f32[256,32], index: 0, kind: input, shape index: {}]   ;;  %s1091_s1 = inlined_call_operand.vmem [shape: f32[16,32], index: 1, kind: input, shape index: {}]   ;;  %s1092_s2 = inlined_call_operand.vmem [shape: f32[1,16], index: 2, kind: input, shape index: {}]   ;;  %s1093_s3 = inlined_call_operand.vmem [shape: f32[256,16], index: 3, kind: output, shape index: {}]  }
   0x1 LB: > { %s681_s13 = sadd.s32 4294967295, %s811_s12   ;;  %p685_p0 = scmp.ge.s32.totalorder %s811_s12, 1  ;;  %s811_s12 = sphi %s833_s12, %s13_s12  }
   0x2   : > { %p138_p1 = scmp.lt.s32.totalorder %s811_s12, 3 }
   0x4   : > { %p139_p2 = pnand %p685_p0, %p138_p1 }
   0x5   : > { %v190_v0 = vld [vmem:[%s1091_s1] sm:$0xff] (!%p139_p2)  ;;  %v191_v1 = vld [vmem:[%s1091_s1 + $0x8] sm:$0xff] (!%p139_p2)  ;;  %vm199_vm0 = vcmask (!%p139_p2), 261120   ;;  %s686_s18 = sshll.u32 (!%p139_p2), %s681_s13, 4  ;;  %vm399_vm2 = vcmask (!%p139_p2), 130048  }
   0x6   : > { %142 = sbr.rel (%p139_p2) target bundleno = 575 (0x23f), region = 32  ;;  %v757_v2 = vpack.c.bf16 (!%p139_p2), %v191_v1, %v190_v0  ;;  %vm758_vm1 = vmpackc.low (!%p139_p2), %vm199_vm0, %vm199_vm0  ;;  %p163_p3 = scmp.lt.s32.totalorder (!%p139_p2), %s686_s18, 31  ;;  %v690_v19 = vld [vmem:[%s1092_s2] ss:$0 sm:$0xff] (!%p139_p2) }
   0x8   : > { %759 = vmatprep.subr.msk.bf16.mxu0 (!%p139_p2), %vm758_vm1, %v757_v2  ;;  %763 = vmatprep.subr.msk.bf16.mxu1 (!%p139_p2), %vm758_vm1, %v757_v2 }
   0x9   : > { %762 = vmatpush3.bf16.xpose.msk.msra.mxu0 (!%p139_p2), %vm758_vm1, %v757_v2  ;;  %764 = vmatpush3.bf16.xpose.msk.msra.mxu1 (!%p139_p2), %vm758_vm1, %v757_v2 }
   0xd   : > { %s1095_s18 = smov (!%p163_p3, %s686_s18), 31 }
   0xe   : > { %s687_s19 = sshll.u32 %s1095_s18, 3 }
   0xf   : > { %s166_s22 = scalar_lea.vmem %s1090_s0, %s687_s19  ;;  %s1037_s27 = scalar_lea.vmem %s1093_s3, %s687_s19 }
  0x10   : > { %v174_v3 = vld [vmem:[%s166_s22] sm:$0xff]  ;;  %v175_v5 = vld [vmem:[%s166_s22 + $0x8] sm:$0xff]  ;;  %v176_v7 = vld [vmem:[%s166_s22 + $0x10] sm:$0xff] }
  0x11   : > { %v182_v4 = vld [vmem:[%s166_s22 + $0x40] sm:$0xff]  ;;  %733 = vmatprep.mubr.msk.f32.mxu0 %vm199_vm0, %v174_v3  ;;  %v183_v6 = vld [vmem:[%s166_s22 + $0x48] sm:$0xff]  ;;  %v184_v8 = vld [vmem:[%s166_s22 + $0x50] sm:$0xff] }
  0x12   : > { %745 = vmatprep.mubr.msk.f32.mxu1 %vm199_vm0, %v182_v4  ;;  %734 = vmatmul.mubr.msk.f32.vlgmr.msra.gmra.mrb[0].mxu0 %vm199_vm0, %v175_v5  ;;  %v177_v9 = vld [vmem:[%s166_s22 + $0x18] sm:$0xff]  ;;  %v178_v11 = vld [vmem:[%s166_s22 + $0x20] sm:$0xff]  ;;  %v179_v13 = vld [vmem:[%s166_s22 + $0x28] sm:$0xff] }
  0x13   : > { %746 = vmatmul.mubr.msk.f32.vlgmr.msra.gmra.mrb[0].mxu1 %vm199_vm0, %v183_v6  ;;  %736 = vmatprep.mubr.msk.f32.mxu0 %vm199_vm0, %v176_v7  ;;  %v185_v10 = vld [vmem:[%s166_s22 + $0x58] sm:$0xff]  ;;  %v186_v12 = vld [vmem:[%s166_s22 + $0x60] sm:$0xff]  ;;  %v187_v14 = vld [vmem:[%s166_s22 + $0x68] sm:$0xff] }
  0x14   : > { %748 = vmatprep.mubr.msk.f32.mxu1 %vm199_vm0, %v184_v8  ;;  %v180_v15 = vld [vmem:[%s166_s22 + $0x30] sm:$0xff]  ;;  %v181_v17 = vld [vmem:[%s166_s22 + $0x38] sm:$0xff] }
  0x15   : > { %v188_v16 = vld [vmem:[%s166_s22 + $0x70] sm:$0xff]  ;;  %v189_v18 = vld [vmem:[%s166_s22 + $0x78] sm:$0xff] }
  0x16   : > { %737 = vmatmul.mubr.msk.f32.gmra.mrb[2].mxu0 %vm199_vm0, %v177_v9 }
  0x17   : > { %749 = vmatmul.mubr.msk.f32.gmra.mrb[2].mxu1 %vm199_vm0, %v185_v10  ;;  %739 = vmatprep.mubr.msk.f32.mxu0 %vm199_vm0, %v178_v11 }
  0x18   : > { %751 = vmatprep.mubr.msk.f32.mxu1 %vm199_vm0, %v186_v12 }
  0x1a   : > { %740 = vmatmul.mubr.msk.f32.gmra.mrb[4].mxu0 %vm199_vm0, %v179_v13 }
  0x1b   : > { %752 = vmatmul.mubr.msk.f32.gmra.mrb[4].mxu1 %vm199_vm0, %v187_v14  ;;  %742 = vmatprep.mubr.msk.f32.mxu0 %vm199_vm0, %v180_v15 }
  0x1c   : > { %754 = vmatprep.mubr.msk.f32.mxu1 %vm199_vm0, %v188_v16 }
  0x1e   : > { %743 = vmatmul.mubr.msk.f32.gmra.mrb[6].mxu0 %vm199_vm0, %v181_v17 }
  0x1f   : > { %755 = vmatmul.mubr.msk.f32.gmra.mrb[6].mxu1 %vm199_vm0, %v189_v18 }
  0xe5   : > { %v735_v20 = vpop.f32.mrb[0].mxu0 }
  0xe6   : > { %v747_v21 = vpop.f32.mrb[0].mxu1  ;;  %v876_v22 = vadd.f32 %v735_v20, %v690_v19  ;;  %v320_v24 = vpop.f32.mrb[1].mxu0 }
  0xe7   : > { %v878_v23 = vadd.f32 %v747_v21, %v690_v19  ;;  %v360_v25 = vpop.f32.mrb[1].mxu1  ;;  %v880_v26 = vadd.f32 %v690_v19, %v320_v24 }
  0xe8   : > { %v403_v28 = vsel %vm399_vm2, %v876_v22, 0.0  ;;  %v888_v35 = vadd.f32 %v690_v19, %v360_v25 }
  0xe9   : > { %v427_v27 = vsel %vm399_vm2, %v878_v23, 0.0  ;;  %404 = vadd.xlane.f32.xlu0 %v403_v28  ;;  %v738_v29 = vpop.f32.mrb[2].mxu0  ;;  %v400_v37 = vsel %vm399_vm2, %v880_v26, 0.0 }
  0xea   : > { %428 = vadd.xlane.f32.xlu1 %v427_v27  ;;  %v750_v30 = vpop.f32.mrb[2].mxu1  ;;  %v336_v31 = vadd.f32 %v738_v29, %v690_v19  ;;  %v330_v32 = vpop.f32.mrb[3].mxu0  ;;  %v424_v45 = vsel %vm399_vm2, %v888_v35, 0.0 }
  0xeb   : > { %v886_v33 = vadd.f32 %v750_v30, %v690_v19  ;;  %v370_v34 = vpop.f32.mrb[3].mxu1  ;;  %v895_v43 = vadd.f32 %v690_v19, %v330_v32 }
  0xec   : > { %v409_v36 = vsel %vm399_vm2, %v336_v31, 0.0  ;;  %v897_v44 = vadd.f32 %v690_v19, %v370_v34 }
  0xed   : > { %401 = vadd.xlane.f32.xlu0 %v400_v37  ;;  %v741_v38 = vpop.f32.mrb[4].mxu0  ;;  %v433_v40 = vsel %vm399_vm2, %v886_v33, 0.0  ;;  %v406_v52 = vsel %vm399_vm2, %v895_v43, 0.0 }
  0xee   : > { %410 = vadd.xlane.f32.xlu1 %v409_v36  ;;  %v753_v39 = vpop.f32.mrb[4].mxu1  ;;  %v340_v41 = vpop.f32.mrb[5].mxu0  ;;  %v901_v48 = vadd.f32 %v741_v38, %v690_v19  ;;  %v430_v53 = vsel %vm399_vm2, %v897_v44, 0.0 }
  0xef   : > { %v380_v42 = vpop.f32.mrb[5].mxu1  ;;  %v903_v49 = vadd.f32 %v690_v19, %v340_v41  ;;  %v909_v54 = vadd.f32 %v753_v39, %v690_v19 }
  0xf0   : > { %v911_v55 = vadd.f32 %v690_v19, %v380_v42  ;;  %v415_v56 = vsel %vm399_vm2, %v901_v48, 0.0 }
  0xf1   : > { %425 = vadd.xlane.f32.xlu0 %v424_v45  ;;  %v744_v46 = vpop.f32.mrb[6].mxu0  ;;  %v412_v57 = vsel %vm399_vm2, %v903_v49, 0.0  ;;  %v439_v60 = vsel %vm399_vm2, %v909_v54, 0.0 }
  0xf2   : > { %434 = vadd.xlane.f32.xlu1 %v433_v40  ;;  %v756_v47 = vpop.f32.mrb[6].mxu1  ;;  %v350_v50 = vpop.f32.mrb[7].mxu0  ;;  %v917_v58 = vadd.f32 %v744_v46, %v690_v19  ;;  %v436_v61 = vsel %vm399_vm2, %v911_v55, 0.0 }
  0xf3   : > { %v390_v51 = vpop.f32.mrb[7].mxu1  ;;  %v919_v59 = vadd.f32 %v690_v19, %v350_v50  ;;  %v925_v62 = vadd.f32 %v756_v47, %v690_v19 }
  0xf4   : > { %v927_v63 = vadd.f32 %v690_v19, %v390_v51  ;;  %v421_v0 = vsel %vm399_vm2, %v917_v58, 0.0 }
  0xf5   : > { %431 = vadd.xlane.f32.xlu0 %v430_v53  ;;  %v418_v1 = vsel %vm399_vm2, %v919_v59, 0.0  ;;  %v445_v2 = vsel %vm399_vm2, %v925_v62, 0.0 }
  0xf6   : > { %407 = vadd.xlane.f32.xlu1 %v406_v52  ;;  %v442_v3 = vsel %vm399_vm2, %v927_v63, 0.0 }
  0xf9   : > { %413 = vadd.xlane.f32.xlu0 %v412_v57 }
  0xfa   : > { %416 = vadd.xlane.f32.xlu1 %v415_v56 }
  0xfd   : > { %437 = vadd.xlane.f32.xlu0 %v436_v61 }
  0xfe   : > { %440 = vadd.xlane.f32.xlu1 %v439_v60 }
 0x101   : > { %419 = vadd.xlane.f32.xlu0 %v418_v1 }
 0x102   : > { %422 = vadd.xlane.f32.xlu1 %v421_v0 }
 0x105   : > { %443 = vadd.xlane.f32.xlu0 %v442_v3 }
 0x106   : > { %446 = vadd.xlane.f32.xlu1 %v445_v2 }
 0x176   : > { %v405_v5 = vpop.xlane.xlu0 %404 }
 0x177   : > { %v429_v4 = vpop.xlane.xlu1 %428  ;;  %v450_v7 = vmul.f32 0.0625, %v405_v5 }
 0x178   : > { %v458_v6 = vmul.f32 0.0625, %v429_v4 }
 0x179   : > { %v941_v9 = vsub.f32 %v876_v22, %v450_v7 }
 0x17a   : > { %v938_v8 = vsub.f32 %v878_v23, %v458_v6  ;;  %v402_v11 = vpop.xlane.xlu0 %401 }
 0x17b   : > { %v411_v10 = vpop.xlane.xlu1 %410  ;;  %v449_v13 = vmul.f32 0.0625, %v402_v11  ;;  %v482_v14 = vmul.f32 %v941_v9, %v941_v9 }
 0x17c   : > { %v452_v12 = vmul.f32 0.0625, %v411_v10  ;;  %v490_v18 = vmul.f32 %v938_v8, %v938_v8 }
 0x17d   : > { %v948_v16 = vsub.f32 %v880_v26, %v449_v13  ;;  %v500_v17 = vsel %vm399_vm2, %v482_v14, 0.0 }
 0x17e   : > { %v945_v15 = vsub.f32 %v336_v31, %v452_v12  ;;  %501 = vadd.xlane.f32.xlu1 %v500_v17  ;;  %v426_v20 = vpop.xlane.xlu0 %425  ;;  %v524_v27 = vsel %vm399_vm2, %v490_v18, 0.0 }
 0x17f   : > { %v435_v19 = vpop.xlane.xlu1 %434  ;;  %v457_v22 = vmul.f32 0.0625, %v426_v20  ;;  %v481_v23 = vmul.f32 %v948_v16, %v948_v16 }
 0x180   : > { %v460_v21 = vmul.f32 0.0625, %v435_v19  ;;  %v484_v24 = vmul.f32 %v945_v15, %v945_v15 }
 0x181   : > { %v961_v26 = vsub.f32 %v888_v35, %v457_v22  ;;  %v497_v28 = vsel %vm399_vm2, %v481_v23, 0.0 }
 0x182   : > { %v958_v25 = vsub.f32 %v886_v33, %v460_v21  ;;  %525 = vadd.xlane.f32.xlu1 %v524_v27  ;;  %498 = vadd.xlane.f32.xlu0 %v497_v28  ;;  %v432_v30 = vpop.xlane.xlu0 %431  ;;  %v506_v36 = vsel %vm399_vm2, %v484_v24, 0.0 }
 0x183   : > { %v408_v29 = vpop.xlane.xlu1 %407  ;;  %v459_v32 = vmul.f32 0.0625, %v432_v30  ;;  %v489_v34 = vmul.f32 %v961_v26, %v961_v26 }
 0x184   : > { %v451_v31 = vmul.f32 0.0625, %v408_v29  ;;  %v492_v38 = vmul.f32 %v958_v25, %v958_v25 }
 0x185   : > { %v972_v35 = vsub.f32 %v897_v44, %v459_v32  ;;  %v521_v37 = vsel %vm399_vm2, %v489_v34, 0.0 }
 0x186   : > { %v969_v33 = vsub.f32 %v895_v43, %v451_v31  ;;  %507 = vadd.xlane.f32.xlu1 %v506_v36  ;;  %522 = vadd.xlane.f32.xlu0 %v521_v37  ;;  %v414_v40 = vpop.xlane.xlu0 %413  ;;  %v530_v47 = vsel %vm399_vm2, %v492_v38, 0.0 }
 0x187   : > { %v417_v39 = vpop.xlane.xlu1 %416  ;;  %v453_v42 = vmul.f32 0.0625, %v414_v40  ;;  %v491_v43 = vmul.f32 %v972_v35, %v972_v35 }
 0x188   : > { %v454_v41 = vmul.f32 0.0625, %v417_v39  ;;  %v483_v45 = vmul.f32 %v969_v33, %v969_v33 }
 0x189   : > { %v985_v46 = vsub.f32 %v903_v49, %v453_v42  ;;  %v527_v60 = vsel %vm399_vm2, %v491_v43, 0.0 }
 0x18a   : > { %v982_v44 = vsub.f32 %v901_v48, %v454_v41  ;;  %v503_v50 = vsel %vm399_vm2, %v483_v45, 0.0  ;;  %531 = vadd.xlane.f32.xlu1 %v530_v47  ;;  %v438_v52 = vpop.xlane.xlu0 %437 }
 0x18b   : > { %v441_v51 = vpop.xlane.xlu1 %440  ;;  %504 = vadd.xlane.f32.xlu0 %v503_v50  ;;  %v461_v56 = vmul.f32 0.0625, %v438_v52  ;;  %v485_v0 = vmul.f32 %v985_v46, %v985_v46 }
 0x18c   : > { %v462_v53 = vmul.f32 0.0625, %v441_v51  ;;  %v486_v57 = vmul.f32 %v982_v44, %v982_v44 }
 0x18d   : > { %v996_v49 = vsub.f32 %v911_v55, %v461_v56  ;;  %v509_v10 = vsel %vm399_vm2, %v485_v0, 0.0 }
 0x18e   : > { %v993_v48 = vsub.f32 %v909_v54, %v462_v53  ;;  %v512_v61 = vsel %vm399_vm2, %v486_v57, 0.0  ;;  %v420_v2 = vpop.xlane.xlu0 %419 }
 0x18f   : > { %513 = vadd.xlane.f32.xlu1 %v512_v61  ;;  %v423_v1 = vpop.xlane.xlu1 %422  ;;  %528 = vadd.xlane.f32.xlu0 %v527_v60  ;;  %v455_v4 = vmul.f32 0.0625, %v420_v2  ;;  %v493_v54 = vmul.f32 %v996_v49, %v996_v49 }
 0x190   : > { %v456_v3 = vmul.f32 0.0625, %v423_v1  ;;  %v494_v5 = vmul.f32 %v993_v48, %v993_v48 }
 0x191   : > { %v1009_v6 = vsub.f32 %v919_v59, %v455_v4  ;;  %v533_v18 = vsel %vm399_vm2, %v493_v54, 0.0 }
 0x192   : > { %v1006_v55 = vsub.f32 %v917_v58, %v456_v3  ;;  %v536_v7 = vsel %vm399_vm2, %v494_v5, 0.0  ;;  %v444_v12 = vpop.xlane.xlu0 %443 }
 0x193   : > { %537 = vadd.xlane.f32.xlu1 %v536_v7  ;;  %v447_v11 = vpop.xlane.xlu1 %446  ;;  %510 = vadd.xlane.f32.xlu0 %v509_v10  ;;  %v463_v14 = vmul.f32 0.0625, %v444_v12  ;;  %v487_v20 = vmul.f32 %v1009_v6, %v1009_v6 }
 0x194   : > { %v464_v13 = vmul.f32 0.0625, %v447_v11  ;;  %v488_v17 = vmul.f32 %v1006_v55, %v1006_v55 }
 0x195   : > { %v1020_v59 = vsub.f32 %v927_v63, %v463_v14  ;;  %v515_v23 = vsel %vm399_vm2, %v487_v20, 0.0 }
 0x196   : > { %v1017_v58 = vsub.f32 %v925_v62, %v464_v13  ;;  %v518_v19 = vsel %vm399_vm2, %v488_v17, 0.0 }
 0x197   : > { %519 = vadd.xlane.f32.xlu1 %v518_v19  ;;  %534 = vadd.xlane.f32.xlu0 %v533_v18  ;;  %v495_v62 = vmul.f32 %v1020_v59, %v1020_v59 }
 0x198   : > { %v496_v21 = vmul.f32 %v1017_v58, %v1017_v58 }
 0x199   : > { %v539_v63 = vsel %vm399_vm2, %v495_v62, 0.0 }
 0x19a   : > { %v542_v22 = vsel %vm399_vm2, %v496_v21, 0.0 }
 0x19b   : > { %543 = vadd.xlane.f32.xlu1 %v542_v22  ;;  %516 = vadd.xlane.f32.xlu0 %v515_v23 }
 0x19f   : > { %540 = vadd.xlane.f32.xlu0 %v539_v63 }
 0x20b   : > { %v502_v24 = vpop.xlane.xlu1 %501 }
 0x20c   : > { %v546_v27 = vmul.f32 0.0625, %v502_v24 }
 0x20e   : > { %v562_v28 = vadd.f32 1e-05, %v546_v27 }
 0x20f   : > { %v526_v29 = vpop.xlane.xlu1 %525  ;;  %v499_v30 = vpop.xlane.xlu0 %498 }
 0x210   : > { %773 = vrsqrt.f32 %v562_v28  ;;  %v554_v31 = vmul.f32 0.0625, %v526_v29  ;;  %v545_v32 = vmul.f32 0.0625, %v499_v30 }
 0x212   : > { %v570_v34 = vadd.f32 1e-05, %v554_v31  ;;  %v561_v36 = vadd.f32 1e-05, %v545_v32 }
 0x213   : > { %v508_v37 = vpop.xlane.xlu1 %507  ;;  %v523_v38 = vpop.xlane.xlu0 %522 }
 0x214   : > { %775 = vrsqrt.f32 %v570_v34  ;;  %v548_v39 = vmul.f32 0.0625, %v508_v37  ;;  %v553_v40 = vmul.f32 0.0625, %v523_v38 }
 0x215   : > { %777 = vrsqrt.f32 %v561_v36 }
 0x216   : > { %v564_v41 = vadd.f32 1e-05, %v548_v39  ;;  %v569_v42 = vadd.f32 1e-05, %v553_v40 }
 0x217   : > { %v532_v45 = vpop.xlane.xlu1 %531 }
 0x218   : > { %v505_v43 = vpop.xlane.xlu0 %504  ;;  %779 = vrsqrt.f32 %v564_v41  ;;  %v556_v47 = vmul.f32 0.0625, %v532_v45 }
 0x219   : > { %v547_v50 = vmul.f32 0.0625, %v505_v43  ;;  %781 = vrsqrt.f32 %v569_v42 }
 0x21a   : > { %v774_v51 = vpop.eup %773  ;;  %v572_v52 = vadd.f32 1e-05, %v556_v47 }
 0x21b   : > { %v563_v53 = vadd.f32 1e-05, %v547_v50  ;;  %v594_v56 = vmul.f32 %v774_v51, %v941_v9 }
 0x21c   : > { %v514_v57 = vpop.xlane.xlu1 %513  ;;  %v529_v60 = vpop.xlane.xlu0 %528  ;;  %783 = vrsqrt.f32 %v572_v52 }
 0x21d   : > { %v550_v61 = vmul.f32 0.0625, %v514_v57  ;;  %v555_v0 = vmul.f32 0.0625, %v529_v60  ;;  %610 = vst.msk [vmem:[%s1037_s27 + $0x8] sm:$0xff] %vm399_vm2, %v594_v56  ;;  %785 = vrsqrt.f32 %v563_v53 }
 0x21e   : > { %v776_v1 = vpop.eup %775 }
 0x21f   : > { %v566_v2 = vadd.f32 1e-05, %v550_v61  ;;  %v571_v3 = vadd.f32 1e-05, %v555_v0  ;;  %v778_v4 = vpop.eup %777  ;;  %v602_v5 = vmul.f32 %v776_v1, %v938_v8 }
 0x220   : > { %v538_v54 = vpop.xlane.xlu1 %537  ;;  %v511_v7 = vpop.xlane.xlu0 %510  ;;  %v593_v9 = vmul.f32 %v778_v4, %v948_v16 }
 0x221   : > { %787 = vrsqrt.f32 %v566_v2  ;;  %v558_v10 = vmul.f32 0.0625, %v538_v54  ;;  %v549_v11 = vmul.f32 0.0625, %v511_v7  ;;  %618 = vst.msk [vmem:[%s1037_s27 + $0x48] sm:$0xff] %vm399_vm2, %v602_v5 }
 0x222   : > { %789 = vrsqrt.f32 %v571_v3  ;;  %v780_v12 = vpop.eup %779  ;;  %609 = vst.msk [vmem:[%s1037_s27] sm:$0xff] %vm399_vm2, %v593_v9 }
 0x223   : > { %v574_v13 = vadd.f32 1e-05, %v558_v10  ;;  %v565_v14 = vadd.f32 1e-05, %v549_v11  ;;  %v782_v17 = vpop.eup %781  ;;  %v596_v8 = vmul.f32 %v780_v12, %v945_v15 }
 0x224   : > { %v520_v18 = vpop.xlane.xlu1 %519  ;;  %v535_v19 = vpop.xlane.xlu0 %534  ;;  %v601_v16 = vmul.f32 %v782_v17, %v961_v26 }
 0x225   : > { %791 = vrsqrt.f32 %v574_v13  ;;  %v552_v20 = vmul.f32 0.0625, %v520_v18  ;;  %v557_v21 = vmul.f32 0.0625, %v535_v19  ;;  %612 = vst.msk [vmem:[%s1037_s27 + $0x18] sm:$0xff] %vm399_vm2, %v596_v8 }
 0x226   : > { %793 = vrsqrt.f32 %v565_v14  ;;  %v784_v22 = vpop.eup %783  ;;  %617 = vst.msk [vmem:[%s1037_s27 + $0x40] sm:$0xff] %vm399_vm2, %v601_v16 }
 0x227   : > { %v568_v23 = vadd.f32 1e-05, %v552_v20  ;;  %v573_v62 = vadd.f32 1e-05, %v557_v21  ;;  %v786_v63 = vpop.eup %785  ;;  %v604_v15 = vmul.f32 %v784_v22, %v958_v25 }
 0x228   : > { %v544_v24 = vpop.xlane.xlu1 %543  ;;  %v517_v27 = vpop.xlane.xlu0 %516  ;;  %v595_v26 = vmul.f32 %v786_v63, %v969_v33 }
 0x229   : > { %795 = vrsqrt.f32 %v568_v23  ;;  %v560_v28 = vmul.f32 0.0625, %v544_v24  ;;  %v551_v29 = vmul.f32 0.0625, %v517_v27  ;;  %620 = vst.msk [vmem:[%s1037_s27 + $0x58] sm:$0xff] %vm399_vm2, %v604_v15 }
 0x22a   : > { %797 = vrsqrt.f32 %v573_v62  ;;  %611 = vst.msk [vmem:[%s1037_s27 + $0x10] sm:$0xff] %vm399_vm2, %v595_v26 }
 0x22b   : > { %v788_v30 = vpop.eup %787  ;;  %v576_v31 = vadd.f32 1e-05, %v560_v28  ;;  %v567_v32 = vadd.f32 1e-05, %v551_v29 }
 0x22c   : > { %v790_v34 = vpop.eup %789  ;;  %v598_v25 = vmul.f32 %v788_v30, %v982_v44  ;;  %v541_v36 = vpop.xlane.xlu0 %540 }
 0x22d   : > { %v603_v33 = vmul.f32 %v790_v34, %v972_v35  ;;  %799 = vrsqrt.f32 %v576_v31  ;;  %v559_v37 = vmul.f32 0.0625, %v541_v36 }
 0x22e   : > { %614 = vst.msk [vmem:[%s1037_s27 + $0x28] sm:$0xff] %vm399_vm2, %v598_v25  ;;  %801 = vrsqrt.f32 %v567_v32 }
 0x22f   : > { %v792_v38 = vpop.eup %791  ;;  %619 = vst.msk [vmem:[%s1037_s27 + $0x50] sm:$0xff] %vm399_vm2, %v603_v33  ;;  %v575_v39 = vadd.f32 1e-05, %v559_v37 }
 0x230   : > { %v794_v40 = vpop.eup %793  ;;  %v606_v41 = vmul.f32 %v792_v38, %v993_v48 }
 0x231   : > { %v597_v44 = vmul.f32 %v794_v40, %v985_v46  ;;  %803 = vrsqrt.f32 %v575_v39 }
 0x232   : > { %622 = vst.msk [vmem:[%s1037_s27 + $0x68] sm:$0xff] %vm399_vm2, %v606_v41 }
 0x233   : > { %v796_v35 = vpop.eup %795  ;;  %613 = vst.msk [vmem:[%s1037_s27 + $0x20] sm:$0xff] %vm399_vm2, %v597_v44 }
 0x234   : > { %v798_v42 = vpop.eup %797  ;;  %v600_v45 = vmul.f32 %v796_v35, %v1006_v55 }
 0x235   : > { %v605_v43 = vmul.f32 %v798_v42, %v996_v49 }
 0x236   : > { %616 = vst.msk [vmem:[%s1037_s27 + $0x38] sm:$0xff] %vm399_vm2, %v600_v45 }
 0x237   : > { %v800_v47 = vpop.eup %799  ;;  %621 = vst.msk [vmem:[%s1037_s27 + $0x60] sm:$0xff] %vm399_vm2, %v605_v43 }
 0x238   : > { %v802_v48 = vpop.eup %801  ;;  %v608_v46 = vmul.f32 %v800_v47, %v1017_v58 }
 0x239   : > { %v599_v50 = vmul.f32 %v802_v48, %v1009_v6 }
 0x23a   : > { %624 = vst.msk [vmem:[%s1037_s27 + $0x78] sm:$0xff] %vm399_vm2, %v608_v46 }
 0x23b   : > { %v804_v51 = vpop.eup %803  ;;  %615 = vst.msk [vmem:[%s1037_s27 + $0x30] sm:$0xff] %vm399_vm2, %v599_v50 }
 0x23c   : > { %v607_v52 = vmul.f32 %v804_v51, %v1020_v59 }
 0x23e   : > { %623 = vst.msk [vmem:[%s1037_s27 + $0x70] sm:$0xff] %vm399_vm2, %v607_v52 }
 0x23f PF: > { %s13_s12 = sadd.s32 1, %s811_s12  }
 0x240   : > { %p10_p4 = scmp.ge.s32.totalorder %s13_s12, 4  }
 0x242   :  { %12 = sbr.rel (!%p10_p4) target bundleno = 1 (0x1), region = 62 }

</bundles_post_ra>
